<compile_context>
chip_gen: v7x
topology: tpu7x:2x2x1
jax: 0.10.0
libtpu: 0.0.40
codegen_flags: <defaults>
</compile_context>

<pallas_src>
import functools
import math

import jax
import jax.numpy as jnp
from jax import lax
from jax.experimental import pallas as pl
from jax.experimental.pallas import tpu as pltpu

_LANE = 128


def _round_up(v, m):
    return ((v + m - 1) // m) * m


def _pick_tile(requested, n, lane=_LANE):
    """128-aligned tile <= requested, capped at the lane-padded extent.

    Prefers (within ~25% of the cap) a size that divides the padded extent
    exactly (zero padding waste); otherwise waste is bounded by < one tile of
    rows/cols (no lcm blow-ups)."""
    full = _round_up(max(n, lane), lane)
    cap = min(_round_up(max(requested, lane), lane), full)
    for cand in range(cap, max(lane, (3 * cap) // 4) - 1, -lane):
        if full % cand == 0:
            return cand
    return cap


def _chip_config():
    """Per-generation tile / VMEM budget (conservative fallback if unknown)."""
    try:
        vmem = getattr(pltpu.get_tpu_info(), "vmem_capacity_bytes", None)
    except Exception:
        vmem = None
    if vmem is not None and vmem > (96 << 20):
        # v5e / v6e: 128 MiB VMEM -> big tiles, bigger scoped VMEM limit.
        return dict(tile_m=1024, tile_k=2048,
                    vmem_limit=96 * 1024 * 1024, adj_buffers=2)
    # v7x (64 MiB VMEM) or unknown chip: smaller tiles, deeper adj pipeline.
    return dict(tile_m=1024, tile_k=1024,
                vmem_limit=40 * 1024 * 1024, adj_buffers=3)


def _support_kernel(x_ref, w_ref, s_ref, *, precision):
    # support = x @ W, computed once in f32, single controlled cast on store.
    s_ref[...] = jnp.dot(
        x_ref[...], w_ref[...],
        preferred_element_type=jnp.float32, precision=precision,
    ).astype(s_ref.dtype)


def _aggregate_kernel(adj_ref, s_ref, b_ref, o_ref, *, precision):
    # out[i] = sum_k adj[i, k] @ support[k] + bias, accumulated directly into
    # the resident f32 output block (no scratch accumulator).
    k = pl.program_id(1)

    @pl.when(k == 0)
    def _init():
        o_ref[...] = jnp.zeros_like(o_ref)

    o_ref[...] += jnp.dot(
        adj_ref[...], s_ref[...],
        preferred_element_type=jnp.float32, precision=precision)

    @pl.when(k == pl.num_programs(1) - 1)
    def _epilogue():
        o_ref[...] += b_ref[...]          # bias added exactly once


def _pad2(a, rows, cols, dtype):
    """Cast + zero-pad in one shot; a no-op when nothing changes."""
    a = a.astype(dtype)
    pr, pc = rows - a.shape[0], cols - a.shape[1]
    if pr or pc:
        a = jnp.pad(a, ((0, pr), (0, pc)))
    return a


def graph_convolution(x, weight, adj, bias=None, *,
                      matmul_dtype=jnp.bfloat16, tile_m=None, tile_k=None):
    """Fused GCN layer: adj @ (x @ weight) + bias.

    x:      [N, F_in]     float32
    weight: [F_in, F_out] float32
    adj:    [N, N]        float32 (dense; spmm treated as a dense matmul)
    bias:   [F_out]       float32 or None
    returns [N, F_out]    float32

    matmul_dtype: dtype fed to the MXU for adj / support (accumulation is
    always f32). bf16 is the default (adj is the memory-bound stream); pass
    jnp.float32 for a strict-precision path (Precision.HIGHEST).
    """
    n, f_in = x.shape
    f_out = weight.shape[1]
    mm_dt = jnp.dtype(matmul_dtype)
    precision = (lax.Precision.HIGHEST if mm_dt == jnp.float32
                 else lax.Precision.DEFAULT)

    cfg = _chip_config()
    tile_m = cfg["tile_m"] if tile_m is None else tile_m
    tile_k = cfg["tile_k"] if tile_k is None else tile_k

    # Lane-dense feature padding (256-aligned when >128: full width of the
    # 256-wide v6e/v7x MXU, free to do at padding time).
    f_in_p = _round_up(f_in, _LANE)
    f_out_p = _round_up(f_out, _LANE)
    if f_out_p > _LANE:
        f_out_p = _round_up(f_out_p, 256)

    # Independent row / column tiling + padding (no lcm blow-up).
    t_m = _pick_tile(tile_m, n)
    t_k = _pick_tile(tile_k, n)
    row_full = _round_up(n, _LANE)
    if row_full // t_m < 2 and row_full >= 2 * _LANE:
        # Keep >= 2 row tiles so the "parallel" axis feeds both v7x cores.
        t_m = _pick_tile(max(_LANE, (row_full // 2 // _LANE) * _LANE), n)
    n_rows_p = _round_up(n, t_m)   # output / adj rows
    n_cols_p = _round_up(n, t_k)   # adj cols == support rows

    x_p = _pad2(x, n_cols_p, f_in_p, jnp.float32)
    w_p = _pad2(weight, f_in_p, f_out_p, jnp.float32)
    adj_p = _pad2(adj, n_rows_p, n_cols_p, mm_dt)   # cast fused into the pad
    b = bias if bias is not None else jnp.zeros((f_out,), jnp.float32)
    b_p = _pad2(b.reshape(1, -1), 1, f_out_p, jnp.float32)

    # --- Pass 1: support = x @ W (computed once). -------------------------
    support = pl.pallas_call(
        functools.partial(_support_kernel, precision=precision),
        out_shape=jax.ShapeDtypeStruct((n_cols_p, f_out_p), mm_dt),
        grid_spec=pltpu.PrefetchScalarGridSpec(
            num_scalar_prefetch=0,
            grid=(n_cols_p // t_k,),
            in_specs=[
                pl.BlockSpec((t_k, f_in_p), lambda i: (i, 0)),
                pl.BlockSpec((f_in_p, f_out_p), lambda i: (0, 0)),
            ],
            out_specs=pl.BlockSpec((t_k, f_out_p), lambda i: (i, 0)),
        ),
        compiler_params=pltpu.CompilerParams(
            dimension_semantics=("parallel",),
            vmem_limit_bytes=cfg["vmem_limit"],
        ),
    )(x_p, w_p)

    # --- Pass 2: out = adj @ support + bias (memory-bound on adj). --------
    if cfg["adj_buffers"] > 2:
        try:
            adj_spec = pl.BlockSpec((t_m, t_k), lambda i, k: (i, k),
                                    pipeline_mode=pl.Buffered(cfg["adj_buffers"]))
        except TypeError:   # pipeline_mode unsupported -> default double-buffer
            adj_spec = pl.BlockSpec((t_m, t_k), lambda i, k: (i, k))
    else:
        adj_spec = pl.BlockSpec((t_m, t_k), lambda i, k: (i, k))

    cost = pl.CostEstimate(
        flops=2 * n_rows_p * n_cols_p * f_out_p,
        transcendentals=0,
        bytes_accessed=(adj_p.size * adj_p.dtype.itemsize
                        + support.size * support.dtype.itemsize
                        + b_p.size * 4
                        + n_rows_p * f_out_p * 4),
    )

    out_p = pl.pallas_call(
        functools.partial(_aggregate_kernel, precision=precision),
        out_shape=jax.ShapeDtypeStruct((n_rows_p, f_out_p), jnp.float32),
        grid_spec=pltpu.PrefetchScalarGridSpec(
            num_scalar_prefetch=0,
            grid=(n_rows_p // t_m, n_cols_p // t_k),
            in_specs=[
                adj_spec,                                            # adj tile
                pl.BlockSpec((t_k, f_out_p), lambda i, k: (k, 0)),   # support
                pl.BlockSpec((1, f_out_p), lambda i, k: (0, 0)),     # bias row
            ],
            out_specs=pl.BlockSpec((t_m, f_out_p), lambda i, k: (i, 0)),
        ),
        compiler_params=pltpu.CompilerParams(
            dimension_semantics=("parallel", "arbitrary"),
            vmem_limit_bytes=cfg["vmem_limit"],
        ),
        cost_estimate=cost,
    )(adj_p, support, b_p)

    return out_p[:n, :f_out]


if __name__ == "__main__":
    # Small, shape-consistent problem: N nodes, F_in input feats, F_out output feats.
    N, F_IN, F_OUT = 64, 32, 32

    key = jax.random.PRNGKey(0)
    k_x, k_adj, k_w, k_b = jax.random.split(key, 4)

    # Node features and a dense, row-normalized adjacency with self-loops.
    x = jax.random.normal(k_x, (N, F_IN), dtype=jnp.float32)
    adj_raw = (jax.random.uniform(k_adj, (N, N)) < 0.2).astype(jnp.float32)
    adj = adj_raw + jnp.eye(N, dtype=jnp.float32)
    adj = adj / jnp.sum(adj, axis=1, keepdims=True)

    # Deterministic parameter init matching reset_parameters():
    #   stdv = 1 / sqrt(out); weight, bias ~ U(-stdv, stdv)
    stdv = 1.0 / math.sqrt(F_OUT)
    weight = jax.random.uniform(
        k_w, (F_IN, F_OUT), minval=-stdv, maxval=stdv, dtype=jnp.float32)
    bias = jax.random.uniform(
        k_b, (F_OUT,), minval=-stdv, maxval=stdv, dtype=jnp.float32)

    ref = adj @ (x @ weight) + bias

    # Default path: bf16 matmul inputs, f32 accumulation (looser tolerance).
    out = jax.block_until_ready(graph_convolution(x, weight, adj, bias))
    assert out.shape == (N, F_OUT)
    assert jnp.allclose(out, ref, atol=3e-2, rtol=3e-2), "bf16 mismatch vs reference"

    # Opt-in strict f32 path (Precision.HIGHEST on the MXU).
    out_f32 = jax.block_until_ready(
        graph_convolution(x, weight, adj, bias, matmul_dtype=jnp.float32))
    assert jnp.allclose(out_f32, ref, atol=1e-4, rtol=1e-4), "f32 mismatch vs reference"

    # bias=None path.
    ref_nb = adj @ (x @ weight)
    out_nb = jax.block_until_ready(
        graph_convolution(x, weight, adj, None, matmul_dtype=jnp.float32))
    assert jnp.allclose(out_nb, ref_nb, atol=1e-4, rtol=1e-4), "no-bias mismatch"

    print("KERNEL_OK")
</pallas_src>

<mosaic_0001>
module attributes {stable_mosaic.version = 11 : i64} {
  func.func @_support_kernel(%arg0: i32, %arg1: memref<128x128xf32, #tpu.memory_space<vmem>>, %arg2: memref<128x128xf32, #tpu.memory_space<vmem>>, %arg3: memref<128x128xbf16, #tpu.memory_space<vmem>>) attributes {dimension_semantics = [#tpu.dimension_semantics<parallel>], iteration_bounds = array<i64: 1>, scalar_prefetch = 0 : i64, scratch_operands = 0 : i64, tpu.core_type = #tpu.core_type<tc>, window_params = [{transform_indices = @transform_0, window_bounds = array<i64: 128, 128>}, {pipeline_mode = #tpu.pipeline_mode<synchronous>, transform_indices = @transform_1, window_bounds = array<i64: 128, 128>}, {transform_indices = @transform_2, window_bounds = array<i64: 128, 128>}]} {
    %c0 = arith.constant 0 : index
    %c0_0 = arith.constant 0 : index
    %0 = vector.load %arg1[%c0, %c0_0] : memref<128x128xf32, #tpu.memory_space<vmem>>, vector<128x128xf32>
    %c0_1 = arith.constant 0 : index
    %c0_2 = arith.constant 0 : index
    %1 = vector.load %arg2[%c0_1, %c0_2] : memref<128x128xf32, #tpu.memory_space<vmem>>, vector<128x128xf32>
    %cst = arith.constant dense<0.000000e+00> : vector<128x128xf32>
    %2 = tpu.matmul %0, %1, %cst {dimension_numbers = #tpu.dot_dimension_numbers<[1], [0], [0], [1], [0, 0, 1, 1], [], []>} : vector<128x128xf32>, vector<128x128xf32>, vector<128x128xf32> -> vector<128x128xf32>
    %3 = arith.truncf %2 : vector<128x128xf32> to vector<128x128xbf16>
    %c0_3 = arith.constant 0 : index
    %c0_4 = arith.constant 0 : index
    %4 = vector.load %arg3[%c0_3, %c0_4] : memref<128x128xbf16, #tpu.memory_space<vmem>>, vector<128x128xbf16>
    tpu.vector_store %arg3[%c0_3, %c0_4], %3 {strides = array<i32>} : memref<128x128xbf16, #tpu.memory_space<vmem>>, vector<128x128xbf16>,
    return
  }
  func.func @transform_0(%arg0: i32) -> (i32, i32) {
    %c0_i32 = arith.constant 0 : i32
    %c0_i32_0 = arith.constant 0 : i32
    return %arg0, %c0_i32 : i32, i32
  }
  func.func @transform_1(%arg0: i32) -> (i32, i32) {
    %c0_i32 = arith.constant 0 : i32
    %c0_i32_0 = arith.constant 0 : i32
    %c0_i32_1 = arith.constant 0 : i32
    return %c0_i32, %c0_i32_0 : i32, i32
  }
  func.func @transform_2(%arg0: i32) -> (i32, i32) {
    %c0_i32 = arith.constant 0 : i32
    %c0_i32_0 = arith.constant 0 : i32
    return %arg0, %c0_i32 : i32, i32
  }
}

</mosaic_0001>

<bundles_post_ra>
// kernel: tpu_custom_call.1
= control target key start
LH: loop header
LB: loop body
LE: loop exit
PB: predicated region body
PF: predicated region fallthrough
CT: control target
= control target key end

     0   :  { %7 = vsyncpa [#allocation3], 0  ;;  %s667_s0 = inlined_call_operand.hbm [shape: f32[128,128], index: 0, kind: input, shape index: {}]   ;;  %s668_s1 = inlined_call_operand.hbm [shape: f32[128,128], index: 1, kind: input, shape index: {}]   ;;  %s669_s2 = inlined_call_operand.hbm [shape: bf16[128,128], index: 2, kind: output, shape index: {}]  }
   0x1   :  { %8 = vsyncpa [#allocation6], 0 }
   0x2   :  { %9 = vsyncpa [#allocation4], 0  ;;  %s609_s9 = smov [#allocation2]   ;;  %s537_s13 = scalar_lea.hbm %s667_s0, 2048 }
   0x3   :  { %s15_s10 = sshll.u32 %s609_s9, 4  ;;  %p538_p0 = scmp.ne.s32.totalorder %s667_s0, %s537_s13  ;;  %s16_s10 = int_to_ptr.vmem [resolvable:$true] %s15_s10 }
   0x4   :  { %p541_p1 = scmp.lt.u32.totalorder %s537_s13, %s667_s0 }
   0x6   :  { %p543_p2 = pnand %p541_p1, %p538_p0 }
   0x8   :  { %546 = shalt.err (!%p543_p2)
}
   0x9   :  { %s547_s18 = scalar_lea.vmem %s16_s10, 2048  ;;  %p552_p4 = scmp.lt.s32.totalorder %s16_s10, %s16_s10 }
   0xa   :  { %p548_p3 = scmp.ne.s32.totalorder %s16_s10, %s547_s18  ;;  %p553_p5 = scmp.lt.s32.totalorder %s547_s18, %s547_s18 }
   0xc   :  { %p554_p6 = por %p553_p5, %p552_p4 }
   0xe   :  { %p555_p7 = pnand %p554_p6, %p548_p3 }
  0x10   :  { %558 = shalt.err (!%p555_p7)
}
  0x11   :  { %s610_s19 = smov 128   ;;  %s611_s20 = smov 8  }
  0x12   :  { %21 = dma.hbm_to_vmem [thread:$0]  %s667_s0, 2048, %s16_s10, [#allocation3], %s610_s19, %s610_s19, %s611_s20  }
  0x13   :  { %s612_s23 = smov [#allocation5]   ;;  %s559_s27 = scalar_lea.hbm %s668_s1, 2048 }
  0x14   :  { %s27_s24 = sshll.u32 %s612_s23, 4  ;;  %p560_p8 = scmp.ne.s32.totalorder %s668_s1, %s559_s27  ;;  %s28_s24 = int_to_ptr.vmem [resolvable:$true] %s27_s24 }
  0x15   :  { %p563_p9 = scmp.lt.u32.totalorder %s559_s27, %s668_s1 }
  0x17   :  { %p565_p10 = pnand %p563_p9, %p560_p8 }
  0x19   :  { %568 = shalt.err (!%p565_p10)
}
  0x1a   :  { %s569_s4 = scalar_lea.vmem %s28_s24, 2048  ;;  %p574_p12 = scmp.lt.s32.totalorder %s28_s24, %s28_s24 }
  0x1b   :  { %p570_p11 = scmp.ne.s32.totalorder %s28_s24, %s569_s4  ;;  %p575_p13 = scmp.lt.s32.totalorder %s569_s4, %s569_s4 }
  0x1d   :  { %p576_p0 = por %p575_p13, %p574_p12 }
  0x1f   :  { %p577_p1 = pnand %p576_p0, %p570_p11 }
  0x21   :  { %580 = shalt.err (!%p577_p1)
}
  0x22   :  { %33 = dma.hbm_to_vmem [thread:$0]  %s668_s1, 2048, %s28_s24, [#allocation6], %s610_s19, %s610_s19, %s611_s20  }
  0x23   :  { %603 = dma.done.wait [#allocation3], 2048  }
  0x24   :  { %604 = vsyncadd [#allocation3], 4294965248 }
  0x25   :  { %605 = dma.done.wait [#allocation6], 2048  }
  0x26   :  { %606 = vsyncadd [#allocation6], 4294965248  ;;  %v56_v0 = vld [vmem:[#allocation5] sm:$0xff]  ;;  %v57_v1 = vld [vmem:[#allocation5 + $0x8] sm:$0xff]  ;;  %s613_s1 = smov [#allocation7]  }
  0x27   :  { %v58_v2 = vld [vmem:[#allocation5 + $0x10] sm:$0xff]  ;;  %v482_v3 = vpack.c.bf16 %v57_v1, %v56_v0  ;;  %v59_v4 = vld [vmem:[#allocation5 + $0x18] sm:$0xff]  ;;  %v60_v6 = vld [vmem:[#allocation5 + $0x20] sm:$0xff]  ;;  %s302_s6 = sshll.u32 %s613_s1, 4  ;;  %s303_s6 = int_to_ptr.vmem [resolvable:$true] %s302_s6 }
  0x28   :  { %v486_v5 = vpack.c.bf16 %v59_v4, %v58_v2  ;;  %v61_v7 = vld [vmem:[#allocation5 + $0x28] sm:$0xff]  ;;  %v40_v9 = vld [vmem:[#allocation2] sm:$0xff]  ;;  %v62_v11 = vld [vmem:[#allocation5 + $0x30] sm:$0xff]  ;;  %s581_s7 = scalar_lea.vmem %s303_s6, 1024  ;;  %p586_p3 = scmp.lt.s32.totalorder %s303_s6, %s303_s6 }
  0x29   :  { %483 = vmatprep.subr.bf16.mxu0 %v482_v3  ;;  %514 = vmatprep.subr.bf16.mxu1 %v482_v3  ;;  %v490_v8 = vpack.c.bf16 %v61_v7, %v60_v6  ;;  %v48_v10 = vld [vmem:[#allocation2 + $0x40] sm:$0xff]  ;;  %v63_v12 = vld [vmem:[#allocation5 + $0x38] sm:$0xff]  ;;  %v65_v15 = vld [vmem:[#allocation5 + $0x48] sm:$0xff]  ;;  %p582_p2 = scmp.ne.s32.totalorder %s303_s6, %s581_s7  ;;  %p587_p4 = scmp.lt.s32.totalorder %s581_s7, %s581_s7 }
  0x2a   :  { %485 = vmatpush3.bf16.msra.mxu0 %v482_v3  ;;  %522 = vmatpush3.bf16.msra.mxu1 %v482_v3  ;;  %v494_v13 = vpack.c.bf16 %v63_v12, %v62_v11  ;;  %v64_v14 = vld [vmem:[#allocation5 + $0x40] sm:$0xff]  ;;  %v66_v17 = vld [vmem:[#allocation5 + $0x50] sm:$0xff]  ;;  %v67_v18 = vld [vmem:[#allocation5 + $0x58] sm:$0xff] }
  0x2b   :  { %487 = vmatprep.subr.bf16.mxu0 %v486_v5  ;;  %515 = vmatprep.subr.bf16.mxu1 %v486_v5  ;;  %v498_v16 = vpack.c.bf16 %v65_v15, %v64_v14  ;;  %v502_v19 = vpack.c.bf16 %v67_v18, %v66_v17  ;;  %v68_v20 = vld [vmem:[#allocation5 + $0x60] sm:$0xff]  ;;  %v69_v21 = vld [vmem:[#allocation5 + $0x68] sm:$0xff]  ;;  %v70_v23 = vld [vmem:[#allocation5 + $0x70] sm:$0xff]  ;;  %p588_p5 = por %p587_p4, %p586_p3 }
  0x2c   :  { %458 = vmatprep.mubr.f32.mxu0 %v40_v9  ;;  %470 = vmatprep.mubr.f32.mxu1 %v48_v10  ;;  %v506_v22 = vpack.c.bf16 %v69_v21, %v68_v20  ;;  %v71_v24 = vld [vmem:[#allocation5 + $0x78] sm:$0xff]  ;;  %v41_v26 = vld [vmem:[#allocation2 + $0x8] sm:$0xff]  ;;  %v42_v28 = vld [vmem:[#allocation2 + $0x10] sm:$0xff] }
  0x2d   :  { %v510_v25 = vpack.c.bf16 %v71_v24, %v70_v23  ;;  %v49_v27 = vld [vmem:[#allocation2 + $0x48] sm:$0xff]  ;;  %v50_v29 = vld [vmem:[#allocation2 + $0x50] sm:$0xff]  ;;  %v43_v30 = vld [vmem:[#allocation2 + $0x18] sm:$0xff]  ;;  %p589_p6 = pnand %p588_p5, %p582_p2 }
  0x2e   :  { %489 = vmatpush3.bf16.msra.mxu0 %v486_v5  ;;  %523 = vmatpush3.bf16.msra.mxu1 %v486_v5  ;;  %v51_v31 = vld [vmem:[#allocation2 + $0x58] sm:$0xff]  ;;  %v44_v32 = vld [vmem:[#allocation2 + $0x20] sm:$0xff]  ;;  %v45_v34 = vld [vmem:[#allocation2 + $0x28] sm:$0xff] }
  0x2f   :  { %491 = vmatprep.subr.bf16.mxu0 %v490_v8  ;;  %516 = vmatprep.subr.bf16.mxu1 %v490_v8  ;;  %v52_v33 = vld [vmem:[#allocation2 + $0x60] sm:$0xff]  ;;  %v53_v35 = vld [vmem:[#allocation2 + $0x68] sm:$0xff]  ;;  %v46_v36 = vld [vmem:[#allocation2 + $0x30] sm:$0xff] }
  0x30   :  { %v54_v37 = vld [vmem:[#allocation2 + $0x70] sm:$0xff]  ;;  %v47_v38 = vld [vmem:[#allocation2 + $0x38] sm:$0xff] }
  0x31   :  { %v55_v39 = vld [vmem:[#allocation2 + $0x78] sm:$0xff] }
  0x32   :  { %493 = vmatpush3.bf16.msra.mxu0 %v490_v8  ;;  %524 = vmatpush3.bf16.msra.mxu1 %v490_v8 }
  0x33   :  { %495 = vmatprep.subr.bf16.mxu0 %v494_v13  ;;  %517 = vmatprep.subr.bf16.mxu1 %v494_v13 }
  0x36   :  { %497 = vmatpush3.bf16.msra.mxu0 %v494_v13  ;;  %525 = vmatpush3.bf16.msra.mxu1 %v494_v13 }
  0x37   :  { %499 = vmatprep.subr.bf16.mxu0 %v498_v16  ;;  %518 = vmatprep.subr.bf16.mxu1 %v498_v16 }
  0x3a   :  { %501 = vmatpush3.bf16.msra.mxu0 %v498_v16  ;;  %526 = vmatpush3.bf16.msra.mxu1 %v498_v16 }
  0x3b   :  { %503 = vmatprep.subr.bf16.mxu0 %v502_v19  ;;  %519 = vmatprep.subr.bf16.mxu1 %v502_v19 }
  0x3e   :  { %505 = vmatpush3.bf16.msra.mxu0 %v502_v19  ;;  %527 = vmatpush3.bf16.msra.mxu1 %v502_v19 }
  0x3f   :  { %507 = vmatprep.subr.bf16.mxu0 %v506_v22  ;;  %520 = vmatprep.subr.bf16.mxu1 %v506_v22 }
  0x42   :  { %509 = vmatpush3.bf16.msra.mxu0 %v506_v22  ;;  %528 = vmatpush3.bf16.msra.mxu1 %v506_v22 }
  0x43   :  { %511 = vmatprep.subr.bf16.mxu0 %v510_v25  ;;  %521 = vmatprep.subr.bf16.mxu1 %v510_v25 }
  0x46   :  { %513 = vmatpush3.bf16.msra.mxu0 %v510_v25  ;;  %529 = vmatpush3.bf16.msra.mxu1 %v510_v25 }
  0x49   :  { %459 = vmatmul.mubr.f32.vlgmr.msra.gmra.mrb[0].mxu0 %v41_v26  ;;  %471 = vmatmul.mubr.f32.vlgmr.msra.gmra.mrb[0].mxu1 %v49_v27 }
  0x4a   :  { %461 = vmatprep.mubr.f32.mxu0 %v42_v28  ;;  %473 = vmatprep.mubr.f32.mxu1 %v50_v29 }
  0x4d   :  { %462 = vmatmul.mubr.f32.gmra.mrb[2].mxu0 %v43_v30  ;;  %474 = vmatmul.mubr.f32.gmra.mrb[2].mxu1 %v51_v31 }
  0x4e   :  { %464 = vmatprep.mubr.f32.mxu0 %v44_v32  ;;  %476 = vmatprep.mubr.f32.mxu1 %v52_v33 }
  0x51   :  { %465 = vmatmul.mubr.f32.gmra.mrb[4].mxu0 %v45_v34  ;;  %477 = vmatmul.mubr.f32.gmra.mrb[4].mxu1 %v53_v35 }
  0x52   :  { %467 = vmatprep.mubr.f32.mxu0 %v46_v36  ;;  %479 = vmatprep.mubr.f32.mxu1 %v54_v37 }
  0x55   :  { %468 = vmatmul.mubr.f32.gmra.mrb[6].mxu0 %v47_v38  ;;  %480 = vmatmul.mubr.f32.gmra.mrb[6].mxu1 %v55_v39 }
 0x11c   :  { %v460_v40 = vpop.f32.mrb[0].mxu0  ;;  %v472_v41 = vpop.f32.mrb[0].mxu1 }
 0x11d   :  { %v138_v42 = vpop.f32.mrb[1].mxu0  ;;  %v178_v43 = vpop.f32.mrb[1].mxu1 }
 0x11e   :  { %v350_v44 = vpack.c.bf16 %v460_v40, %v138_v42  ;;  %v370_v45 = vpack.c.bf16 %v472_v41, %v178_v43 }
 0x120   :  { %351 = vst [vmem:[#allocation7] sm:$0xff] %v350_v44   ;;  %390 = vst [vmem:[#allocation7 + $0x20] sm:$0xff] %v370_v45   ;;  %v463_v46 = vpop.f32.mrb[2].mxu0  ;;  %v475_v47 = vpop.f32.mrb[2].mxu1 }
 0x121   :  { %v148_v48 = vpop.f32.mrb[3].mxu0  ;;  %v188_v49 = vpop.f32.mrb[3].mxu1 }
 0x122   :  { %v355_v50 = vpack.c.bf16 %v463_v46, %v148_v48  ;;  %v375_v51 = vpack.c.bf16 %v475_v47, %v188_v49 }
 0x124   :  { %387 = vst [vmem:[#allocation7 + $0x8] sm:$0xff] %v355_v50   ;;  %391 = vst [vmem:[#allocation7 + $0x28] sm:$0xff] %v375_v51   ;;  %v466_v52 = vpop.f32.mrb[4].mxu0  ;;  %v478_v53 = vpop.f32.mrb[4].mxu1 }
 0x125   :  { %v158_v54 = vpop.f32.mrb[5].mxu0  ;;  %v198_v55 = vpop.f32.mrb[5].mxu1 }
 0x126   :  { %v360_v56 = vpack.c.bf16 %v466_v52, %v158_v54  ;;  %v380_v57 = vpack.c.bf16 %v478_v53, %v198_v55 }
 0x128   :  { %388 = vst [vmem:[#allocation7 + $0x10] sm:$0xff] %v360_v56   ;;  %392 = vst [vmem:[#allocation7 + $0x30] sm:$0xff] %v380_v57   ;;  %v469_v58 = vpop.f32.mrb[6].mxu0  ;;  %v481_v59 = vpop.f32.mrb[6].mxu1 }
 0x129   :  { %v168_v60 = vpop.f32.mrb[7].mxu0  ;;  %v208_v61 = vpop.f32.mrb[7].mxu1 }
 0x12a   :  { %v365_v62 = vpack.c.bf16 %v469_v58, %v168_v60  ;;  %v385_v63 = vpack.c.bf16 %v481_v59, %v208_v61 }
 0x12c   :  { %389 = vst [vmem:[#allocation7 + $0x18] sm:$0xff] %v365_v62   ;;  %393 = vst [vmem:[#allocation7 + $0x38] sm:$0xff] %v385_v63  }
 0x12d   :  { %592 = shalt.err (!%p589_p6)
}
 0x12e   :  { %s593_s10 = scalar_lea.hbm %s669_s2, 1024 }
 0x12f   :  { %p594_p7 = scmp.ne.s32.totalorder %s669_s2, %s593_s10  ;;  %p597_p8 = scmp.lt.u32.totalorder %s593_s10, %s669_s2 }
 0x131   :  { %p599_p9 = pnand %p597_p8, %p594_p7 }
 0x133   :  { %602 = shalt.err (!%p599_p9)
}
 0x134   :  { %s614_s15 = smov 64   ;;  %s615_s16 = smov 4  }
 0x135   :  { %308 = dma.vmem_to_hbm [thread:$0]  %s303_s6, 1024, %s669_s2, [#allocation4], %s614_s15, %s614_s15, %s615_s16  }
 0x136   :  { %607 = dma.done.wait [#allocation4], 1024  }
 0x137   :  { %608 = vsyncadd [#allocation4], 4294966272 }
 0x138   :  { %312 = vsyncpa [#allocation3], 1 }
 0x139   :  { %313 = vsyncpa [#allocation6], 1 }
 0x13a   :  { %314 = vsyncpa [#allocation4], 1 }

</bundles_post_ra>
